<compile_context>
chip_gen: v6e
topology: v6e:2x2x1
jax: 0.10.0
libtpu: 0.0.40
codegen_flags: <defaults>
</compile_context>

<pallas_src>
import functools

import jax
import jax.numpy as jnp
from jax.experimental import pallas as pl
from jax.experimental.pallas import tpu as pltpu

HIDDEN = 256
LANE = 128


def _round_up(x, m):
    return ((x + m - 1) // m) * m


def classifier_kernel(x_ref, w1_ref, b1_ref, w2_ref, b2_ref, o_ref):
    # fc1 on the MXU: bf16 x bf16 -> f32 accumulate
    h = jnp.dot(x_ref[...], w1_ref[...], preferred_element_type=jnp.float32)
    # bias + ReLU in f32 on the VPU
    h = jnp.maximum(h + b1_ref[...], 0.0)
    # single cast to bf16 for the fc2 MXU input, accumulate in f32
    y = jnp.dot(h.astype(w2_ref.dtype), w2_ref[...],
                preferred_element_type=jnp.float32)
    o_ref[...] = (y + b2_ref[...]).astype(o_ref.dtype)


@functools.partial(jax.jit, static_argnames=("tb",))
def classifier_forward(x, w1, b1, w2, b2, *, tb=256):
    """Forward pass of Classifier (eval mode).

    x : (B, in_dim) float
    w1: (in_dim, 256)  (pre-transposed vs. torch's (256, in_dim))
    b1: (256,) or (1, 256)
    w2: (256, n_cls)
    b2: (n_cls,) or (1, n_cls)
    returns (B, n_cls) float32
    """
    B, in_dim = x.shape
    n_cls = w2.shape[-1]

    # --- lane-dense output: pad n_cls up to a multiple of 128 ---------------
    n_pad = max(LANE, _round_up(n_cls, LANE))
    w2p = jnp.zeros((HIDDEN, n_pad), jnp.float32).at[:, :n_cls].set(
        w2.astype(jnp.float32))
    b2p = jnp.zeros((1, n_pad), jnp.float32).at[:, :n_cls].set(
        b2.reshape(1, -1).astype(jnp.float32))
    b1p = b1.reshape(1, HIDDEN).astype(jnp.float32)

    # --- batch tiling: large tile, pad B so every block is full -------------
    tb = int(min(tb, max(16, _round_up(B, 16))))
    Bp = _round_up(B, tb)
    xp = x.astype(jnp.float32)
    if Bp != B:
        xp = jnp.pad(xp, ((0, Bp - B), (0, 0)))

    # --- bf16 MXU inputs (accumulation stays f32 inside the kernel) ---------
    x_bf = xp.astype(jnp.bfloat16)
    w1_bf = w1.astype(jnp.bfloat16)
    w2_bf = w2p.astype(jnp.bfloat16)

    grid = (Bp // tb,)

    # --- explicit VMEM budget (double-buffered ins/outs + resident weights) --
    vmem_est = (
        2 * in_dim * HIDDEN * 2        # W1 bf16 (x2 buffering headroom)
        + 2 * HIDDEN * n_pad * 2       # W2 bf16
        + 2 * (HIDDEN + n_pad) * 4     # biases f32
        + 2 * tb * in_dim * 2          # double-buffered x tiles (bf16)
        + 2 * tb * n_pad * 4           # double-buffered out tiles (f32)
    )
    vmem_limit = int(min(max(2 * vmem_est + (4 << 20), 32 << 20), 64 << 20))

    cost = pl.CostEstimate(
        flops=2 * Bp * in_dim * HIDDEN + 2 * Bp * HIDDEN * n_pad,
        transcendentals=0,
        bytes_accessed=(x_bf.size * 2 + w1_bf.size * 2 + w2_bf.size * 2
                        + (HIDDEN + n_pad) * 4 + Bp * n_pad * 4),
    )

    out = pl.pallas_call(
        classifier_kernel,
        out_shape=jax.ShapeDtypeStruct((Bp, n_pad), jnp.float32),
        grid_spec=pltpu.PrefetchScalarGridSpec(
            num_scalar_prefetch=0,
            grid=grid,
            in_specs=[
                pl.BlockSpec((tb, in_dim), lambda i: (i, 0)),       # x tile
                pl.BlockSpec((in_dim, HIDDEN), lambda i: (0, 0)),   # W1 (resident)
                pl.BlockSpec((1, HIDDEN), lambda i: (0, 0)),        # b1
                pl.BlockSpec((HIDDEN, n_pad), lambda i: (0, 0)),    # W2 (resident)
                pl.BlockSpec((1, n_pad), lambda i: (0, 0)),         # b2
            ],
            out_specs=pl.BlockSpec((tb, n_pad), lambda i: (i, 0)),
        ),
        compiler_params=pltpu.CompilerParams(
            dimension_semantics=("parallel",),
            vmem_limit_bytes=vmem_limit,
        ),
        cost_estimate=cost,
    )(x_bf, w1_bf, b1p, w2_bf, b2p)

    # strip batch padding and lane padding
    return out[:B, :n_cls]


def init_params(key, in_dim, n_cls):
    """Deterministic init mimicking nn.Linear's U(-1/sqrt(fan_in), 1/sqrt(fan_in))."""
    k1, k2, k3, k4 = jax.random.split(key, 4)
    lim1 = 1.0 / jnp.sqrt(in_dim)
    w1 = jax.random.uniform(k1, (in_dim, HIDDEN), jnp.float32, -lim1, lim1)
    b1 = jax.random.uniform(k2, (1, HIDDEN), jnp.float32, -lim1, lim1)
    lim2 = 1.0 / jnp.sqrt(HIDDEN)
    w2 = jax.random.uniform(k3, (HIDDEN, n_cls), jnp.float32, -lim2, lim2)
    b2 = jax.random.uniform(k4, (1, n_cls), jnp.float32, -lim2, lim2)
    return w1, b1, w2, b2


if __name__ == "__main__":
    # small, non-aligned shapes: exercise batch padding + n_cls lane padding
    B, in_dim, n_cls = 300, 320, 10

    key = jax.random.PRNGKey(0)
    kx, kp = jax.random.split(key)
    x = jax.random.normal(kx, (B, in_dim), jnp.float32)
    w1, b1, w2, b2 = init_params(kp, in_dim, n_cls)

    out = classifier_forward(x, w1, b1, w2, b2, tb=128)
    out = jax.block_until_ready(out)

    # pure-JAX reference with the same bf16-input / f32-accumulate recipe
    xb, w1b, w2b = (x.astype(jnp.bfloat16), w1.astype(jnp.bfloat16),
                    w2.astype(jnp.bfloat16))
    h_ref = jnp.maximum(
        jnp.dot(xb, w1b, preferred_element_type=jnp.float32) + b1, 0.0)
    ref = jnp.dot(h_ref.astype(jnp.bfloat16), w2b,
                  preferred_element_type=jnp.float32) + b2

    assert out.shape == (B, n_cls)
    assert jnp.allclose(out, ref, atol=2e-2, rtol=2e-2), "mismatch vs reference"

    # loose sanity check against the full-f32 math as well
    ref_f32 = jnp.maximum(x @ w1 + b1, 0.0) @ w2 + b2
    assert jnp.max(jnp.abs(out - ref_f32)) < 0.2

    print("KERNEL_OK")
</pallas_src>

<mosaic_0001>
module attributes {stable_mosaic.version = 11 : i64} {
  func.func @classifier_kernel(%arg0: i32, %arg1: memref<128x320xbf16, #tpu.memory_space<vmem>>, %arg2: memref<320x256xbf16, #tpu.memory_space<vmem>>, %arg3: memref<1x256xf32, #tpu.memory_space<vmem>>, %arg4: memref<256x128xbf16, #tpu.memory_space<vmem>>, %arg5: memref<1x128xf32, #tpu.memory_space<vmem>>, %arg6: memref<128x128xf32, #tpu.memory_space<vmem>>) attributes {dimension_semantics = [#tpu.dimension_semantics<parallel>], iteration_bounds = array<i64: 3>, scalar_prefetch = 0 : i64, scratch_operands = 0 : i64, tpu.core_type = #tpu.core_type<tc>, window_params = [{transform_indices = @transform_0, window_bounds = array<i64: 128, 320>}, {pipeline_mode = #tpu.pipeline_mode<synchronous>, transform_indices = @transform_1, window_bounds = array<i64: 320, 256>}, {pipeline_mode = #tpu.pipeline_mode<synchronous>, transform_indices = @transform_2, window_bounds = array<i64: 1, 256>}, {pipeline_mode = #tpu.pipeline_mode<synchronous>, transform_indices = @transform_3, window_bounds = array<i64: 256, 128>}, {pipeline_mode = #tpu.pipeline_mode<synchronous>, transform_indices = @transform_4, window_bounds = array<i64: 1, 128>}, {transform_indices = @transform_5, window_bounds = array<i64: 128, 128>}]} {
    %c0 = arith.constant 0 : index
    %c0_0 = arith.constant 0 : index
    %0 = vector.load %arg1[%c0, %c0_0] : memref<128x320xbf16, #tpu.memory_space<vmem>>, vector<128x320xbf16>
    %c0_1 = arith.constant 0 : index
    %c0_2 = arith.constant 0 : index
    %1 = vector.load %arg2[%c0_1, %c0_2] : memref<320x256xbf16, #tpu.memory_space<vmem>>, vector<320x256xbf16>
    %cst = arith.constant dense<0.000000e+00> : vector<128x256xf32>
    %2 = tpu.matmul %0, %1, %cst {dimension_numbers = #tpu.dot_dimension_numbers<[1], [0], [0], [1], [0, 0, 1, 1], [], []>} : vector<128x320xbf16>, vector<320x256xbf16>, vector<128x256xf32> -> vector<128x256xf32>
    %c0_3 = arith.constant 0 : index
    %c0_4 = arith.constant 0 : index
    %3 = vector.load %arg3[%c0_3, %c0_4] : memref<1x256xf32, #tpu.memory_space<vmem>>, vector<1x256xf32>
    %4 = vector.broadcast %3 : vector<1x256xf32> to vector<128x256xf32>
    %5 = arith.addf %2, %4 : vector<128x256xf32>
    %cst_5 = arith.constant 0.000000e+00 : f32
    %6 = vector.broadcast %cst_5 : f32 to vector<128x256xf32>
    %7 = arith.maximumf %5, %6 : vector<128x256xf32>
    %8 = arith.truncf %7 : vector<128x256xf32> to vector<128x256xbf16>
    %c0_6 = arith.constant 0 : index
    %c0_7 = arith.constant 0 : index
    %9 = vector.load %arg4[%c0_6, %c0_7] : memref<256x128xbf16, #tpu.memory_space<vmem>>, vector<256x128xbf16>
    %cst_8 = arith.constant dense<0.000000e+00> : vector<128x128xf32>
    %10 = tpu.matmul %8, %9, %cst_8 {dimension_numbers = #tpu.dot_dimension_numbers<[1], [0], [0], [1], [0, 0, 1, 1], [], []>} : vector<128x256xbf16>, vector<256x128xbf16>, vector<128x128xf32> -> vector<128x128xf32>
    %c0_9 = arith.constant 0 : index
    %c0_10 = arith.constant 0 : index
    %11 = vector.load %arg5[%c0_9, %c0_10] : memref<1x128xf32, #tpu.memory_space<vmem>>, vector<1x128xf32>
    %12 = vector.broadcast %11 : vector<1x128xf32> to vector<128x128xf32>
    %13 = arith.addf %10, %12 : vector<128x128xf32>
    %c0_11 = arith.constant 0 : index
    %c0_12 = arith.constant 0 : index
    %14 = vector.load %arg6[%c0_11, %c0_12] : memref<128x128xf32, #tpu.memory_space<vmem>>, vector<128x128xf32>
    tpu.vector_store %arg6[%c0_11, %c0_12], %13 {strides = array<i32>} : memref<128x128xf32, #tpu.memory_space<vmem>>, vector<128x128xf32>,
    return
  }
  func.func @transform_0(%arg0: i32) -> (i32, i32) {
    %c0_i32 = arith.constant 0 : i32
    %c0_i32_0 = arith.constant 0 : i32
    return %arg0, %c0_i32 : i32, i32
  }
  func.func @transform_1(%arg0: i32) -> (i32, i32) {
    %c0_i32 = arith.constant 0 : i32
    %c0_i32_0 = arith.constant 0 : i32
    %c0_i32_1 = arith.constant 0 : i32
    return %c0_i32, %c0_i32_0 : i32, i32
  }
  func.func @transform_2(%arg0: i32) -> (i32, i32) {
    %c0_i32 = arith.constant 0 : i32
    %c0_i32_0 = arith.constant 0 : i32
    %c0_i32_1 = arith.constant 0 : i32
    return %c0_i32, %c0_i32_0 : i32, i32
  }
  func.func @transform_3(%arg0: i32) -> (i32, i32) {
    %c0_i32 = arith.constant 0 : i32
    %c0_i32_0 = arith.constant 0 : i32
    %c0_i32_1 = arith.constant 0 : i32
    return %c0_i32, %c0_i32_0 : i32, i32
  }
  func.func @transform_4(%arg0: i32) -> (i32, i32) {
    %c0_i32 = arith.constant 0 : i32
    %c0_i32_0 = arith.constant 0 : i32
    %c0_i32_1 = arith.constant 0 : i32
    return %c0_i32, %c0_i32_0 : i32, i32
  }
  func.func @transform_5(%arg0: i32) -> (i32, i32) {
    %c0_i32 = arith.constant 0 : i32
    %c0_i32_0 = arith.constant 0 : i32
    return %arg0, %c0_i32 : i32, i32
  }
}

</mosaic_0001>

<bundles_post_ra>
// kernel: classifier_forward.1
= control target key start
LH: loop header
LB: loop body
LE: loop exit
PB: predicated region body
PF: predicated region fallthrough
CT: control target
= control target key end

     0   :  { %s1568_s18 = smov 0   ;;  %s2031_s0 = inlined_call_operand.vmem [shape: bf16[384,320], index: 0, kind: input, shape index: {}]   ;;  %s2032_s1 = inlined_call_operand.vmem [shape: bf16[320,256], index: 1, kind: input, shape index: {}]   ;;  %s2033_s2 = inlined_call_operand.vmem [shape: f32[1,256], index: 2, kind: input, shape index: {}]   ;;  %s2034_s3 = inlined_call_operand.vmem [shape: bf16[256,128], index: 3, kind: input, shape index: {}]   ;;  %s2035_s4 = inlined_call_operand.vmem [shape: f32[1,128], index: 4, kind: input, shape index: {}]   ;;  %s2036_s5 = inlined_call_operand.vmem [shape: f32[384,128], index: 5, kind: output, shape index: {}]  }
   0x1 LB: > { %s1239_s19 = sadd.s32 4294967295, %s1535_s18   ;;  %p1243_p0 = scmp.ge.s32.totalorder %s1535_s18, 1  ;;  %s1535_s18 = sphi %s1568_s18, %s15_s18  }
   0x2   : > { %p189_p1 = scmp.lt.s32.totalorder %s1535_s18, 4 }
   0x4   : > { %p190_p2 = pnand %p1243_p0, %p189_p1 }
   0x5   : > { %s1244_s30 = sshll.u32 (!%p190_p2), %s1239_s19, 4 }
   0x6   : > { %193 = sbr.rel (%p190_p2) target bundleno = 606 (0x25e), region = 40  ;;  %p219_p3 = scmp.lt.s32.totalorder (!%p190_p2), %s1244_s30, 47 }
   0xb   : > { %v1421_v0 = vld [vmem:[%s2032_s1 + $0x74] ss:$8 sps:$4 sm:$0xff]   ;;  %v1423_v1 = vld [vmem:[%s2032_s1 + $0x70] ss:$8 sps:$4 sm:$0xff]   ;;  %v1537_v2 = vmov 0   ;;  %s2038_s30 = smov (!%p219_p3, %s1244_s30), 47 }
   0xc   : > { %816 = vmatprep.mubr.bf16.mxu1 %v1537_v2  ;;  %661 = vmatprep.subr.bf16.mxu0 %v1421_v0  ;;  %v1424_v3 = vld [vmem:[%s2032_s1 + $0x64] ss:$8 sps:$4 sm:$0xff]   ;;  %v1426_v4 = vld [vmem:[%s2032_s1 + $0x60] ss:$8 sps:$4 sm:$0xff]   ;;  %v1427_v5 = vld [vmem:[%s2032_s1 + $0x54] ss:$8 sps:$4 sm:$0xff]  }
   0xd   : > { %662 = vmatpush1.bf16.msra.mxu0 %v1423_v1  ;;  %v1429_v6 = vld [vmem:[%s2032_s1 + $0x50] ss:$8 sps:$4 sm:$0xff]   ;;  %v1430_v7 = vld [vmem:[%s2032_s1 + $0x44] ss:$8 sps:$4 sm:$0xff]   ;;  %v1432_v8 = vld [vmem:[%s2032_s1 + $0x40] ss:$8 sps:$4 sm:$0xff]  }
   0xe   : > { %663 = vmatprep.subr.bf16.mxu0 %v1424_v3  ;;  %v1433_v9 = vld [vmem:[%s2032_s1 + $0x34] ss:$8 sps:$4 sm:$0xff]   ;;  %v1435_v10 = vld [vmem:[%s2032_s1 + $0x30] ss:$8 sps:$4 sm:$0xff]   ;;  %v1436_v11 = vld [vmem:[%s2032_s1 + $0x24] ss:$8 sps:$4 sm:$0xff]  }
   0xf   : > { %s1411_s19 = smul.u32 12, %s2038_s30  ;;  %v1438_v12 = vld [vmem:[%s2032_s1 + $0x20] ss:$8 sps:$4 sm:$0xff]   ;;  %v1439_v13 = vld [vmem:[%s2032_s1 + $0x14] ss:$8 sps:$4 sm:$0xff]   ;;  %vm636_vm0 = vcmask 523264  }
  0x10   : > { %v1622_v14 = vld [vmem:[%s2032_s1 + $0x134] ss:$8 sps:$4 sm:$0xff]   ;;  %v1627_v15 = vld [vmem:[%s2032_s1 + $0x130] ss:$8 sps:$4 sm:$0xff]   ;;  %v1642_v17 = vld [vmem:[%s2032_s1 + $0x124] ss:$8 sps:$4 sm:$0xff]  }
  0x11   : > { %664 = vmatpush1.bf16.msra.mxu0 %v1426_v4  ;;  %s1632_s6 = scalar_lea.vmem %s2031_s0, %s1411_s19  ;;  %v1441_v16 = vld [vmem:[%s2032_s1 + $0x10] ss:$8 sps:$4 sm:$0xff]   ;;  %1403 = vmatprep.subr.bf16.mxu1 %v1622_v14  ;;  %v1442_v18 = vld [vmem:[%s2032_s1 + $0x4] ss:$8 sps:$4 sm:$0xff]   ;;  %v1652_v20 = vld [vmem:[%s2032_s1 + $0x120] ss:$8 sps:$4 sm:$0xff]  }
  0x12   : > { %665 = vmatprep.subr.bf16.mxu0 %v1427_v5  ;;  %1407 = vmatpush1.bf16.msra.mxu1 %v1627_v15  ;;  %v1476_v19 = vld [vmem:[%s1632_s6 + $0x4] ss:$12 sps:$4 sm:$0xff]   ;;  %v1444_v21 = vld [vmem:[%s2032_s1] ss:$8 sps:$4 sm:$0xff]   ;;  %v1660_v22 = vld [vmem:[%s2032_s1 + $0x114] ss:$8 sps:$4 sm:$0xff]  }
  0x13   : > { %1404 = vmatprep.subr.bf16.mxu1 %v1642_v17  ;;  %693 = vmatprep.mubr.bf16.mxu0 %v1476_v19  ;;  %v1666_v23 = vld [vmem:[%s2032_s1 + $0x110] ss:$8 sps:$4 sm:$0xff]   ;;  %v1445_v24 = vld [vmem:[%s2032_s1 + $0xf4] ss:$8 sps:$4 sm:$0xff]   ;;  %v1675_v25 = vld [vmem:[%s2032_s1 + $0x104] ss:$8 sps:$4 sm:$0xff]  }
  0x14   : > { %v1447_v26 = vld [vmem:[%s2032_s1 + $0xf0] ss:$8 sps:$4 sm:$0xff]   ;;  %v1684_v27 = vld [vmem:[%s2032_s1 + $0x100] ss:$8 sps:$4 sm:$0xff]   ;;  %v1448_v28 = vld [vmem:[%s2032_s1 + $0xe4] ss:$8 sps:$4 sm:$0xff]  }
  0x15   : > { %666 = vmatpush1.bf16.msra.mxu0 %v1429_v6  ;;  %v1487_v29 = vld [vmem:[%s1632_s6 + $0x20] ss:$12 sps:$4 sm:$0xff]   ;;  %v1451_v31 = vld [vmem:[%s2032_s1 + $0xd4] ss:$8 sps:$4 sm:$0xff]   ;;  %v1453_v32 = vld [vmem:[%s2032_s1 + $0xd0] ss:$8 sps:$4 sm:$0xff]  }
  0x16   : > { %667 = vmatprep.subr.bf16.mxu0 %v1430_v7  ;;  %1408 = vmatpush1.bf16.msra.mxu1 %v1652_v20  ;;  %v1450_v30 = vld [vmem:[%s2032_s1 + $0xe0] ss:$8 sps:$4 sm:$0xff]   ;;  %v1454_v33 = vld [vmem:[%s2032_s1 + $0xc4] ss:$8 sps:$4 sm:$0xff]   ;;  %v1457_v36 = vld [vmem:[%s2032_s1 + $0xb4] ss:$8 sps:$4 sm:$0xff]  }
  0x17   : > { %1405 = vmatprep.subr.bf16.mxu1 %v1660_v22  ;;  %v1491_v34 = vld [vmem:[%s1632_s6 + $0x38] ss:$12 sps:$4 sm:$0xff]   ;;  %v1456_v35 = vld [vmem:[%s2032_s1 + $0xc0] ss:$8 sps:$4 sm:$0xff]   ;;  %v1495_v39 = vld [vmem:[%s1632_s6 + $0x50] ss:$12 sps:$4 sm:$0xff]  }
  0x18   : > { %v1459_v37 = vld [vmem:[%s2032_s1 + $0xb0] ss:$8 sps:$4 sm:$0xff]   ;;  %v1460_v38 = vld [vmem:[%s2032_s1 + $0xa4] ss:$8 sps:$4 sm:$0xff]   ;;  %v1462_v40 = vld [vmem:[%s2032_s1 + $0xa0] ss:$8 sps:$4 sm:$0xff]  }
  0x19   : > { %668 = vmatpush1.bf16.msra.mxu0 %v1432_v8  ;;  %v1463_v41 = vld [vmem:[%s2032_s1 + $0x94] ss:$8 sps:$4 sm:$0xff]   ;;  %v1465_v42 = vld [vmem:[%s2032_s1 + $0x90] ss:$8 sps:$4 sm:$0xff]   ;;  %v1469_v43 = vld [vmem:[%s2032_s1 + $0x84] ss:$8 sps:$4 sm:$0xff]  }
  0x1a   : > { %669 = vmatprep.subr.bf16.mxu0 %v1433_v9  ;;  %1409 = vmatpush1.bf16.msra.mxu1 %v1666_v23  ;;  %v1499_v44 = vld [vmem:[%s1632_s6 + $0x68] ss:$12 sps:$4 sm:$0xff]   ;;  %v1474_v46 = vld [vmem:[%s1632_s6] ss:$12 sps:$4 sm:$0xff]   ;;  %v1486_v49 = vld [vmem:[%s1632_s6 + $0x18] ss:$12 sps:$4 sm:$0xff]  }
  0x1b   : > { %1406 = vmatprep.subr.bf16.mxu1 %v1675_v25  ;;  %v1471_v45 = vld [vmem:[%s2032_s1 + $0x80] ss:$8 sps:$4 sm:$0xff]   ;;  %v1507_v51 = vld [vmem:[%s1632_s6 + $0x98] ss:$12 sps:$4 sm:$0xff]   ;;  %v1490_v52 = vld [vmem:[%s1632_s6 + $0x30] ss:$12 sps:$4 sm:$0xff]  }
  0x1c   : > { %v1483_v47 = vld [vmem:[%s1632_s6 + $0x1c] ss:$12 sps:$4 sm:$0xff]   ;;  %v1503_v48 = vld [vmem:[%s1632_s6 + $0x80] ss:$12 sps:$4 sm:$0xff]   ;;  %v1496_v56 = vld [vmem:[%s1632_s6 + $0x64] ss:$12 sps:$4 sm:$0xff]  }
  0x1d   : > { %670 = vmatpush1.bf16.msra.mxu0 %v1435_v10  ;;  %v1488_v50 = vld [vmem:[%s1632_s6 + $0x34] ss:$12 sps:$4 sm:$0xff]   ;;  %v1492_v53 = vld [vmem:[%s1632_s6 + $0x4c] ss:$12 sps:$4 sm:$0xff]   ;;  %v1511_v54 = vld [vmem:[%s1632_s6 + $0xb0] ss:$12 sps:$4 sm:$0xff]  }
  0x1e   : > { %671 = vmatprep.subr.bf16.mxu0 %v1436_v11  ;;  %1410 = vmatpush1.bf16.msra.mxu1 %v1684_v27  ;;  %v1494_v55 = vld [vmem:[%s1632_s6 + $0x48] ss:$12 sps:$4 sm:$0xff]   ;;  %v1498_v57 = vld [vmem:[%s1632_s6 + $0x60] ss:$12 sps:$4 sm:$0xff]   ;;  %v1502_v59 = vld [vmem:[%s1632_s6 + $0x78] ss:$12 sps:$4 sm:$0xff]  }
  0x1f   : > { %v1500_v58 = vld [vmem:[%s1632_s6 + $0x7c] ss:$12 sps:$4 sm:$0xff]   ;;  %v1504_v60 = vld [vmem:[%s1632_s6 + $0x94] ss:$12 sps:$4 sm:$0xff]   ;;  %v1508_v62 = vld [vmem:[%s1632_s6 + $0xac] ss:$12 sps:$4 sm:$0xff]  }
  0x20   : > { %v1506_v61 = vld [vmem:[%s1632_s6 + $0x90] ss:$12 sps:$4 sm:$0xff]   ;;  %v1510_v63 = vld [vmem:[%s1632_s6 + $0xa8] ss:$12 sps:$4 sm:$0xff]   ;;  %v1519_v7 = vld [vmem:[%s2034_s3 + $0x60] sm:$0xff]   ;;  %s1247_s24 = sshll.u32 %s2038_s30, 3 }
  0x21   : > { %672 = vmatpush1.bf16.msra.mxu0 %v1438_v12  ;;  %1313 = vmatmul.mubr.msk.bf16.vlgmr.msra.gmra.mxu1 %vm636_vm0, %v1487_v29  ;;  %v1512_v0 = vld [vmem:[%s1632_s6 + $0x8] ss:$12 sps:$4 sm:$0xff]   ;;  %v1513_v1 = vld [vmem:[%s2034_s3 + $0x78] sm:$0xff]   ;;  %v1520_v8 = vld [vmem:[%s2034_s3 + $0x20] sm:$0xff]   ;;  %s1994_s29 = scalar_lea.vmem %s2036_s5, %s1247_s24 }
  0x22   : > { %673 = vmatprep.subr.bf16.mxu0 %v1439_v13  ;;  %826 = vmatprep.mubr.bf16.mxu1 %v1537_v2  ;;  %v1514_v3 = vld [vmem:[%s2034_s3 + $0x38] sm:$0xff]   ;;  %v1515_v4 = vld [vmem:[%s2034_s3 + $0x70] sm:$0xff]   ;;  %v1517_v5 = vld [vmem:[%s2034_s3 + $0x68] sm:$0xff]  }
  0x23   : > { %1339 = vmatprep.subr.bf16.mxu1 %v1513_v1  ;;  %v1518_v6 = vld [vmem:[%s2034_s3 + $0x28] sm:$0xff]   ;;  %v1521_v9 = vld [vmem:[%s2034_s3 + $0x58] sm:$0xff]   ;;  %v1523_v11 = vld [vmem:[%s2034_s3 + $0x50] sm:$0xff]  }
  0x24   : > { %1340 = vmatpush3.bf16.msra.mxu1 %v1514_v3  ;;  %v1522_v10 = vld [vmem:[%s2034_s3 + $0x18] sm:$0xff]   ;;  %v1524_v12 = vld [vmem:[%s2034_s3 + $0x10] sm:$0xff]   ;;  %v1525_v13 = vld [vmem:[%s2034_s3 + $0x48] sm:$0xff]  }
  0x25   : > { %674 = vmatpush1.bf16.msra.mxu0 %v1441_v16  ;;  %1341 = vmatprep.subr.bf16.mxu1 %v1515_v4  ;;  %v1528_v16 = vld [vmem:[%s2034_s3] sm:$0xff]  }
  0x26   : > { %675 = vmatprep.subr.bf16.mxu0 %v1442_v18 }
  0x29   : > { %676 = vmatpush1.bf16.msra.mxu0 %v1444_v21  ;;  %1314 = vmatmul.mubr.msk.bf16.gmra.mxu1 %vm636_vm0, %v1491_v34  ;;  %v1846_v34 = vld [vmem:[%s2033_s2] sm:$0x3] }
  0x2a   : > { %677 = vmatprep.subr.bf16.mxu0 %v1445_v24  ;;  %836 = vmatprep.mubr.bf16.mxu1 %v1537_v2 }
  0x2d   : > { %678 = vmatpush2.bf16.msra.mxu0 %v1447_v26 }
  0x2e   : > { %679 = vmatprep.subr.bf16.mxu0 %v1448_v28 }
  0x31   : > { %680 = vmatpush2.bf16.msra.mxu0 %v1450_v30  ;;  %1315 = vmatmul.mubr.msk.bf16.gmra.mxu1 %vm636_vm0, %v1495_v39 }
  0x32   : > { %681 = vmatprep.subr.bf16.mxu0 %v1451_v31  ;;  %846 = vmatprep.mubr.bf16.mxu1 %v1537_v2 }
  0x35   : > { %682 = vmatpush2.bf16.msra.mxu0 %v1453_v32 }
  0x36   : > { %683 = vmatprep.subr.bf16.mxu0 %v1454_v33 }
  0x39   : > { %684 = vmatpush2.bf16.msra.mxu0 %v1456_v35  ;;  %1316 = vmatmul.mubr.msk.bf16.gmra.mxu1 %vm636_vm0, %v1499_v44 }
  0x3a   : > { %685 = vmatprep.subr.bf16.mxu0 %v1457_v36  ;;  %856 = vmatprep.mubr.bf16.mxu1 %v1537_v2 }
  0x3d   : > { %686 = vmatpush2.bf16.msra.mxu0 %v1459_v37 }
  0x3e   : > { %687 = vmatprep.subr.bf16.mxu0 %v1460_v38 }
  0x41   : > { %688 = vmatpush2.bf16.msra.mxu0 %v1462_v40  ;;  %1317 = vmatmul.mubr.msk.bf16.gmra.mxu1 %vm636_vm0, %v1503_v48 }
  0x42   : > { %689 = vmatprep.subr.bf16.mxu0 %v1463_v41  ;;  %866 = vmatprep.mubr.bf16.mxu1 %v1537_v2 }
  0x45   : > { %690 = vmatpush2.bf16.msra.mxu0 %v1465_v42 }
  0x46   : > { %691 = vmatprep.subr.bf16.mxu0 %v1469_v43 }
  0x49   : > { %692 = vmatpush2.bf16.msra.mxu0 %v1471_v45  ;;  %1318 = vmatmul.mubr.msk.bf16.gmra.mxu1 %vm636_vm0, %v1507_v51 }
  0x4a   : > { %782 = vmatprep.subr.bf16.mxu0 %v1622_v14  ;;  %876 = vmatprep.mubr.bf16.mxu1 %v1537_v2  ;;  %v1526_v14 = vld [vmem:[%s2034_s3 + $0x8] sm:$0xff]  }
  0x4c   : > { %694 = vmatmul.mubr.bf16.vlgmr.msra.gmra.mxu0 %v1474_v46 }
  0x4d   : > { %783 = vmatpush1.bf16.msra.mxu0 %v1627_v15  ;;  %703 = vmatprep.mubr.bf16.mxu0 %v1483_v47  ;;  %v1527_v15 = vld [vmem:[%s2034_s3 + $0x40] sm:$0xff]  }
  0x4e   : > { %784 = vmatprep.subr.bf16.mxu0 %v1642_v17 }
  0x51   : > { %785 = vmatpush1.bf16.msra.mxu0 %v1652_v20  ;;  %1319 = vmatmul.mubr.msk.bf16.gmra.mxu1 %vm636_vm0, %v1511_v54 }
  0x52   : > { %786 = vmatprep.subr.bf16.mxu0 %v1660_v22 }
  0x54   : > { %704 = vmatmul.mubr.bf16.gmra.mxu0 %v1486_v49 }
  0x55   : > { %713 = vmatprep.mubr.bf16.mxu0 %v1488_v50  ;;  %787 = vmatpush1.bf16.msra.mxu0 %v1666_v23 }
  0x56   : > { %788 = vmatprep.subr.bf16.mxu0 %v1675_v25 }
  0x59   : > { %789 = vmatpush1.bf16.msra.mxu0 %v1684_v27  ;;  %v306_v27 = vlaneseq }
  0x5b   : > { %v1834_v29 = vshrl.u32 %v306_v27, 7 }
  0x5c   : > { %714 = vmatmul.mubr.bf16.gmra.mxu0 %v1490_v52 }
  0x5d   : > { %723 = vmatprep.mubr.bf16.mxu0 %v1492_v53  ;;  %v308_v33 = vsub.s32 0, %v1834_v29 }
  0x5f   : > { %v1853_v38 = vrot.slane %v1846_v34, %v308_v33 }
  0x64   : > { %724 = vmatmul.mubr.bf16.gmra.mxu0 %v1494_v55 }
  0x65   : > { %733 = vmatprep.mubr.bf16.mxu0 %v1496_v56 }
  0x6c   : > { %734 = vmatmul.mubr.bf16.gmra.mxu0 %v1498_v57 }
  0x6d   : > { %743 = vmatprep.mubr.bf16.mxu0 %v1500_v58 }
  0x74   : > { %744 = vmatmul.mubr.bf16.gmra.mxu0 %v1502_v59 }
  0x75   : > { %753 = vmatprep.mubr.bf16.mxu0 %v1504_v60 }
  0x7c   : > { %754 = vmatmul.mubr.bf16.gmra.mxu0 %v1506_v61 }
  0x7d   : > { %763 = vmatprep.mubr.bf16.mxu0 %v1508_v62 }
  0x84   : > { %764 = vmatmul.mubr.bf16.gmra.mxu0 %v1510_v63 }
  0x85   : > { %806 = vmatprep.mubr.bf16.mxu0 %v1537_v2  ;;  %v1516_v2 = vld [vmem:[%s2034_s3 + $0x30] sm:$0xff]  }
  0x86   : > { %1342 = vmatpush3.bf16.msra.mxu1 %v1516_v2 }
  0x87   : > { %1343 = vmatprep.subr.bf16.mxu1 %v1517_v5 }
  0x8a   : > { %1344 = vmatpush3.bf16.msra.mxu1 %v1518_v6 }
  0x8b   : > { %1345 = vmatprep.subr.bf16.mxu1 %v1519_v7 }
  0x8c   : > { %1312 = vmatmul.mubr.msk.bf16.vlgmr.msra.gmra.mxu0 %vm636_vm0, %v1512_v0 }
  0x8e   : > { %1346 = vmatpush3.bf16.msra.mxu1 %v1520_v8 }
  0x8f   : > { %1347 = vmatprep.subr.bf16.mxu1 %v1521_v9 }
  0x92   : > { %1348 = vmatpush3.bf16.msra.mxu1 %v1522_v10 }
  0x93   : > { %1349 = vmatprep.subr.bf16.mxu1 %v1523_v11 }
  0x96   : > { %1350 = vmatpush3.bf16.msra.mxu1 %v1524_v12 }
  0x97   : > { %1351 = vmatprep.subr.bf16.mxu1 %v1525_v13 }
  0x9a   : > { %1352 = vmatpush3.bf16.msra.mxu1 %v1526_v14 }
  0x9b   : > { %1353 = vmatprep.subr.bf16.mxu1 %v1527_v15 }
  0x9e   : > { %1354 = vmatpush3.bf16.msra.mxu1 %v1528_v16 }
  0xe1   : > { %v818_v17 = vpop.f32.mrf.mxu1 }
  0xe3   : > { %v1824_v18 = vpop.f32.mrf.mxu1 }
  0xe5   : > { %v822_v19 = vpop.f32.mrf.mxu1 }
  0xe7   : > { %v1826_v20 = vpop.f32.mrf.mxu1 }
  0xe9   : > { %v828_v21 = vpop.f32.mrf.mxu1 }
  0xeb   : > { %v1828_v22 = vpop.f32.mrf.mxu1 }
  0xed   : > { %v832_v23 = vpop.f32.mrf.mxu1 }
  0xef   : > { %v1830_v24 = vpop.f32.mrf.mxu1 }
  0xf1   : > { %v838_v25 = vpop.f32.mrf.mxu1 }
  0xf3   : > { %v1832_v26 = vpop.f32.mrf.mxu1 }
  0xf5   : > { %v842_v28 = vpop.f32.mrf.mxu1 }
  0xf7   : > { %v1838_v31 = vpop.f32.mrf.mxu1 }
  0xf9   : > { %v848_v36 = vpop.f32.mrf.mxu1 }
  0xfb   : > { %v1855_v40 = vpop.f32.mrf.mxu1 }
  0xfd   : > { %v852_v44 = vpop.f32.mrf.mxu1 }
  0xff   : > { %v1863_v50 = vpop.f32.mrf.mxu1 }
 0x101   : > { %v858_v57 = vpop.f32.mrf.mxu1 }
 0x103   : > { %v1873_v63 = vpop.f32.mrf.mxu1 }
 0x105   : > { %v862_v6 = vpop.f32.mrf.mxu1 }
 0x107   : > { %v1883_v12 = vpop.f32.mrf.mxu1 }
 0x10c   : > { %v1836_v30 = vpop.f32.mrf.mxu0 }
 0x10e   : > { %v1840_v32 = vpop.f32.mrf.mxu0 }
 0x110   : > { %v1848_v35 = vpop.f32.mrf.mxu0 }
 0x112   : > { %v1850_v37 = vpop.f32.mrf.mxu0 }
 0x114   : > { %v705_v39 = vpop.f32.mrf.mxu0 }
 0x115   : > { %v706_v41 = vadd.f32 %v705_v39, %v1853_v38 }
 0x116   : > { %v1858_v42 = vpop.f32.mrf.mxu0 }
 0x117   : > { %v819_v45 = vadd.f32 %v818_v17, %v706_v41 }
 0x118   : > { %v709_v43 = vpop.f32.mrf.mxu0 }
 0x119   : > { %v710_v46 = vadd.f32 %v709_v43, %v1853_v38  ;;  %v891_v51 = vmax.f32 %v819_v45, 0.0 }
 0x11a   : > { %v1861_v47 = vpop.f32.mrf.mxu0 }
 0x11b   : > { %v823_v48 = vadd.f32 %v822_v19, %v710_v46 }
 0x11c   : > { %v715_v49 = vpop.f32.mrf.mxu0 }
 0x11d   : > { %v893_v52 = vmax.f32 %v823_v48, 0.0  ;;  %v716_v53 = vadd.f32 %v715_v49, %v1853_v38 }
 0x11e   : > { %v1866_v54 = vpop.f32.mrf.mxu0 }
 0x11f   : > { %v1868_v55 = vpack.c.bf16 %v893_v52, %v891_v51  ;;  %v829_v58 = vadd.f32 %v828_v21, %v716_v53  ;;  %v868_v21 = vpop.f32.mrf.mxu1 }
 0x120   : > { %v719_v56 = vpop.f32.mrf.mxu0 }
 0x121   : > { %v720_v59 = vadd.f32 %v719_v56, %v1853_v38  ;;  %v895_v0 = vmax.f32 %v829_v58, 0.0  ;;  %v1893_v39 = vpop.f32.mrf.mxu1 }
 0x122   : > { %v1871_v60 = vpop.f32.mrf.mxu0 }
 0x123   : > { %v833_v61 = vadd.f32 %v832_v23, %v720_v59  ;;  %v872_v51 = vpop.f32.mrf.mxu1 }
 0x124   : > { %v725_v62 = vpop.f32.mrf.mxu0 }
 0x125   : > { %v897_v1 = vmax.f32 %v833_v61, 0.0  ;;  %v726_v3 = vadd.f32 %v725_v62, %v1853_v38  ;;  %v1903_v58 = vpop.f32.mrf.mxu1 }
 0x126   : > { %v1876_v4 = vpop.f32.mrf.mxu0 }
 0x127   : > { %v1878_v2 = vpack.c.bf16 %v897_v1, %v895_v0  ;;  %v839_v7 = vadd.f32 %v838_v25, %v726_v3 }
 0x128   : > { %v729_v5 = vpop.f32.mrf.mxu0 }
 0x129   : > { %v730_v8 = vadd.f32 %v729_v5, %v1853_v38  ;;  %v899_v13 = vmax.f32 %v839_v7, 0.0  ;;  %v878_v5 = vpop.f32.mrf.mxu1 }
 0x12a   : > { %v1881_v9 = vpop.f32.mrf.mxu0 }
 0x12b   : > { %v843_v10 = vadd.f32 %v842_v28, %v730_v8 }
 0x12c   : > { %v735_v11 = vpop.f32.mrf.mxu0 }
 0x12d   : > { %v901_v14 = vmax.f32 %v843_v10, 0.0  ;;  %v736_v15 = vadd.f32 %v735_v11, %v1853_v38  ;;  %v1913_v11 = vpop.f32.mrf.mxu1 }
 0x12e   : > { %v1886_v16 = vpop.f32.mrf.mxu0 }
 0x12f   : > { %v1888_v17 = vpack.c.bf16 %v901_v14, %v899_v13  ;;  %v849_v23 = vadd.f32 %v848_v36, %v736_v15 }
 0x130   : > { %v739_v19 = vpop.f32.mrf.mxu0 }
 0x131   : > { %v740_v25 = vadd.f32 %v739_v19, %v1853_v38  ;;  %v903_v41 = vmax.f32 %v849_v23, 0.0  ;;  %v312_v19 = vsub.s32 1, %v1834_v29  ;;  %v696_v29 = vadd.f32 %v1836_v30, %v1853_v38 }
 0x132   : > { %v1891_v27 = vpop.f32.mrf.mxu0 }
 0x133   : > { %v853_v33 = vadd.f32 %v852_v44, %v740_v25 }
 0x134   : > { %v745_v28 = vpop.f32.mrf.mxu0 }
 0x135   : > { %v905_v43 = vmax.f32 %v853_v33, 0.0  ;;  %v746_v45 = vadd.f32 %v745_v28, %v1853_v38 }
 0x136   : > { %v1896_v46 = vpop.f32.mrf.mxu0 }
 0x137   : > { %v1898_v48 = vpack.c.bf16 %v905_v43, %v903_v41  ;;  %v859_v52 = vadd.f32 %v858_v57, %v746_v45  ;;  %v1923_v43 = vrot.slane %v1846_v34, %v312_v19  ;;  %v700_v34 = vadd.f32 %v1848_v35, %v1853_v38 }
 0x138   : > { %v749_v49 = vpop.f32.mrf.mxu0 }
 0x139   : > { %v750_v36 = vadd.f32 %v749_v49, %v1853_v38  ;;  %v907_v59 = vmax.f32 %v859_v52, 0.0  ;;  %v702_v30 = vadd.f32 %v1850_v37, %v1923_v43 }
 0x13a   : > { %v1901_v53 = vpop.f32.mrf.mxu0 }
 0x13b   : > { %v863_v56 = vadd.f32 %v862_v6, %v750_v36 }
 0x13c   : > { %v755_v44 = vpop.f32.mrf.mxu0 }
 0x13d   : > { %v909_v61 = vmax.f32 %v863_v56, 0.0  ;;  %v756_v62 = vadd.f32 %v755_v44, %v1853_v38  ;;  %v698_v44 = vadd.f32 %v1840_v32, %v1923_v43 }
 0x13e   : > { %v1906_v0 = vpop.f32.mrf.mxu0 }
 0x13f   : > { %v1908_v1 = vpack.c.bf16 %v909_v61, %v907_v59  ;;  %v869_v7 = vadd.f32 %v868_v21, %v756_v62  ;;  %v882_v21 = vpop.f32.mrf.mxu1  ;;  %v708_v61 = vadd.f32 %v1858_v42, %v1923_v43  ;;  %v722_v42 = vadd.f32 %v1871_v60, %v1923_v43 }
 0x140   : > { %v759_v3 = vpop.f32.mrf.mxu0  ;;  %v732_v60 = vadd.f32 %v1881_v9, %v1923_v43  ;;  %v738_v9 = vadd.f32 %v1886_v16, %v1923_v43 }
 0x141   : > { %v760_v57 = vadd.f32 %v759_v3, %v1853_v38  ;;  %v911_v13 = vmax.f32 %v869_v7, 0.0  ;;  %v821_v32 = vadd.f32 %v1824_v18, %v708_v61 }
 0x142   : > { %v1911_v8 = vpop.f32.mrf.mxu0 }
 0x143   : > { %v873_v10 = vadd.f32 %v872_v51, %v760_v57  ;;  %v712_v51 = vadd.f32 %v1861_v47, %v1923_v43 }
 0x144   : > { %v765_v6 = vpop.f32.mrf.mxu0 }
 0x145   : > { %v913_v14 = vmax.f32 %v873_v10, 0.0  ;;  %v766_v15 = vadd.f32 %v765_v6, %v1853_v38  ;;  %v825_v47 = vadd.f32 %v1826_v20, %v712_v51  ;;  %v892_v20 = vmax.f32 %v821_v32, 0.0 }
 0x146   : > { %v1917_v23 = vpop.f32.mrf.mxu0  ;;  %v728_v51 = vadd.f32 %v1876_v4, %v1923_v43 }
 0x147   : > { %v1919_v25 = vpack.c.bf16 %v913_v14, %v911_v13  ;;  %v879_v28 = vadd.f32 %v878_v5, %v766_v15 }
 0x148   : > { %v769_v33 = vpop.f32.mrf.mxu0 }
 0x149   : > { %v770_v41 = vadd.f32 %v769_v33, %v1853_v38  ;;  %v915_v36 = vmax.f32 %v879_v28, 0.0  ;;  %v894_v38 = vmax.f32 %v825_v47, 0.0  ;;  %v718_v33 = vadd.f32 %v1866_v54, %v1923_v43 }
 0x14a   : > { %v1925_v45 = vpop.f32.mrf.mxu0  ;;  %v835_v28 = vadd.f32 %v1830_v24, %v722_v42  ;;  %v845_v54 = vadd.f32 %v1838_v31, %v732_v60  ;;  %v841_v24 = vadd.f32 %v1832_v26, %v728_v51  ;;  %v851_v31 = vadd.f32 %v1855_v40, %v738_v9 }
 0x14b   : > { %v883_v49 = vadd.f32 %v882_v21, %v770_v41  ;;  %v922_v21 = vpack.c.bf16 %v894_v38, %v892_v20  ;;  %v831_v18 = vadd.f32 %v1828_v22, %v718_v33  ;;  %v742_v22 = vadd.f32 %v1891_v27, %v1923_v43 }
 0x14c   : > { %v808_v52 = vpop.f32.mrf.mxu0  ;;  %v898_v41 = vmax.f32 %v835_v28, 0.0  ;;  %v752_v26 = vadd.f32 %v1901_v53, %v1923_v43  ;;  %v904_v4 = vmax.f32 %v851_v31, 0.0  ;;  %v748_v27 = vadd.f32 %v1896_v46, %v1923_v43  ;;  %v884_v46 = vpop.f32.mrf.mxu1 }
 0x14d   : > { %v917_v56 = vmax.f32 %v883_v49, 0.0  ;;  %v809_v3 = vadd.f32 %v808_v52, %v696_v29  ;;  %v896_v49 = vmax.f32 %v831_v18, 0.0  ;;  %v902_v29 = vmax.f32 %v845_v54, 0.0 }
 0x14e   : > { %v810_v59 = vpop.f32.mrf.mxu0  ;;  %v762_v40 = vadd.f32 %v1911_v8, %v1923_v43  ;;  %v758_v53 = vadd.f32 %v1906_v0, %v1923_v43  ;;  %v768_v8 = vadd.f32 %v1917_v23, %v1923_v43  ;;  %v1989_v23 = vld [vmem:[%s2035_s4] ss:$0 sm:$0xff] }
 0x14f   : > { %v1937_v62 = vpack.c.bf16 %v917_v56, %v915_v36  ;;  %v811_v7 = vadd.f32 %v810_v59, %v698_v44  ;;  %v887_v6 = vmax.f32 %v809_v3, 0.0  ;;  %v924_v52 = vpack.c.bf16 %v898_v41, %v896_v49 }
 0x150   : > { %v812_v5 = vpop.f32.mrf.mxu0  ;;  %v900_v36 = vmax.f32 %v841_v24, 0.0  ;;  %v855_v44 = vadd.f32 %v1863_v50, %v742_v22  ;;  %v861_v50 = vadd.f32 %v1873_v63, %v748_v27  ;;  %v875_v3 = vadd.f32 %v1903_v58, %v762_v40 }
 0x151   : > { %v813_v57 = vadd.f32 %v812_v5, %v700_v34  ;;  %v888_v14 = vmax.f32 %v811_v7, 0.0  ;;  %v865_v34 = vadd.f32 %v1883_v12, %v752_v26  ;;  %v871_v12 = vadd.f32 %v1893_v39, %v758_v53 }
 0x152   : > { %v814_v10 = vpop.f32.mrf.mxu0  ;;  %v926_v56 = vpack.c.bf16 %v902_v29, %v900_v36  ;;  %v908_v16 = vmax.f32 %v861_v50, 0.0  ;;  %v772_v63 = vadd.f32 %v1925_v45, %v1923_v43  ;;  %v881_v58 = vadd.f32 %v1913_v11, %v768_v8 }
 0x153   : > { %v889_v13 = vmax.f32 %v813_v57, 0.0  ;;  %v815_v35 = vadd.f32 %v814_v10, %v702_v30  ;;  %v912_v47 = vmax.f32 %v871_v12, 0.0 }
 0x154   : > { %v885_v0 = vadd.f32 %v884_v46, %v772_v63  ;;  %v916_v39 = vmax.f32 %v881_v58, 0.0 }
 0x155   : > { %v919_v15 = vpack.c.bf16 %v889_v13, %v887_v6  ;;  %v890_v19 = vmax.f32 %v815_v35, 0.0 }
 0x157   : > { %v920_v37 = vpack.c.bf16 %v890_v19, %v888_v14 }
 0x159   : > { %1102 = vmatprep.mubr.bf16.mxu1 %v920_v37 }
 0x15a   : > { %1103 = vmatmul.mubr.bf16.vlgmr.msra.gmra.mxu1 %v919_v15 }
 0x15b   : > { %1110 = vmatprep.mubr.bf16.mxu1 %v922_v21 }
 0x162   : > { %1111 = vmatmul.mubr.bf16.gmra.mxu1 %v1868_v55  ;;  %v906_v55 = vmax.f32 %v855_v44, 0.0 }
 0x163   : > { %1118 = vmatprep.mubr.bf16.mxu1 %v924_v52 }
 0x164   : > { %v928_v59 = vpack.c.bf16 %v906_v55, %v904_v4 }
 0x16a   : > { %1119 = vmatmul.mubr.bf16.gmra.mxu1 %v1878_v2  ;;  %v910_v2 = vmax.f32 %v865_v34, 0.0 }
 0x16b   : > { %1126 = vmatprep.mubr.bf16.mxu1 %v926_v56 }
 0x16c   : > { %v930_v61 = vpack.c.bf16 %v910_v2, %v908_v16 }
 0x172   : > { %1127 = vmatmul.mubr.bf16.gmra.mxu1 %v1888_v17  ;;  %v914_v17 = vmax.f32 %v875_v3, 0.0 }
 0x173   : > { %1134 = vmatprep.mubr.bf16.mxu1 %v928_v59 }
 0x174   : > { %v932_v5 = vpack.c.bf16 %v914_v17, %v912_v47 }
 0x17a   : > { %1135 = vmatmul.mubr.bf16.gmra.mxu1 %v1898_v48  ;;  %v918_v48 = vmax.f32 %v885_v0, 0.0 }
 0x17b   : > { %1142 = vmatprep.mubr.bf16.mxu1 %v930_v61 }
 0x17c   : > { %v934_v30 = vpack.c.bf16 %v918_v48, %v916_v39 }
 0x182   : > { %1143 = vmatmul.mubr.bf16.gmra.mxu1 %v1908_v1 }
 0x183   : > { %1150 = vmatprep.mubr.bf16.mxu1 %v932_v5 }
 0x18a   : > { %1151 = vmatmul.mubr.bf16.gmra.mxu1 %v1919_v25 }
 0x18b   : > { %1158 = vmatprep.mubr.bf16.mxu1 %v934_v30 }
 0x192   : > { %1159 = vmatmul.mubr.bf16.gmra.mxu1 %v1937_v62 }
 0x21a   : > { %v1355_v45 = vpop.f32.mrf.mxu1 }
 0x21c   : > { %v1356_v43 = vpop.f32.mrf.mxu1 }
 0x21d   : > { %v1357_v1 = vadd.f32 %v1356_v43, %v1355_v45 }
 0x21e   : > { %v1358_v11 = vpop.f32.mrf.mxu1 }
 0x21f   : > { %v1105_v25 = vadd.f32 %v1357_v1, %v1989_v23 }
 0x220   : > { %v1359_v62 = vpop.f32.mrf.mxu1 }
 0x221   : > { %1167 = vst [vmem:[%s1994_s29] sm:$0xff] %v1105_v25  ;;  %v1360_v7 = vadd.f32 %v1359_v62, %v1358_v11 }
 0x222   : > { %v1361_v57 = vpop.f32.mrf.mxu1 }
 0x223   : > { %v1108_v10 = vadd.f32 %v1360_v7, %v1989_v23 }
 0x224   : > { %v1362_v32 = vpop.f32.mrf.mxu1 }
 0x225   : > { %1168 = vst [vmem:[%s1994_s29 + $0x8] sm:$0xff] %v1108_v10  ;;  %v1363_v6 = vadd.f32 %v1362_v32, %v1361_v57 }
 0x226   : > { %v1364_v13 = vpop.f32.mrf.mxu1 }
 0x227   : > { %v1113_v35 = vadd.f32 %v1363_v6, %v1989_v23 }
 0x228   : > { %v1365_v38 = vpop.f32.mrf.mxu1 }
 0x229   : > { %1169 = vst [vmem:[%s1994_s29 + $0x10] sm:$0xff] %v1113_v35  ;;  %v1366_v42 = vadd.f32 %v1365_v38, %v1364_v13 }
 0x22a   : > { %v1367_v14 = vpop.f32.mrf.mxu1 }
 0x22b   : > { %v1116_v15 = vadd.f32 %v1366_v42, %v1989_v23 }
 0x22c   : > { %v1368_v19 = vpop.f32.mrf.mxu1 }
 0x22d   : > { %1170 = vst [vmem:[%s1994_s29 + $0x18] sm:$0xff] %v1116_v15  ;;  %v1369_v20 = vadd.f32 %v1368_v19, %v1367_v14 }
 0x22e   : > { %v1370_v33 = vpop.f32.mrf.mxu1 }
 0x22f   : > { %v1121_v37 = vadd.f32 %v1369_v20, %v1989_v23 }
 0x230   : > { %v1371_v21 = vpop.f32.mrf.mxu1 }
 0x231   : > { %1171 = vst [vmem:[%s1994_s29 + $0x20] sm:$0xff] %v1121_v37  ;;  %v1372_v28 = vadd.f32 %v1371_v21, %v1370_v33 }
 0x232   : > { %v1373_v18 = vpop.f32.mrf.mxu1 }
 0x233   : > { %v1124_v41 = vadd.f32 %v1372_v28, %v1989_v23 }
 0x234   : > { %v1374_v60 = vpop.f32.mrf.mxu1 }
 0x235   : > { %1172 = vst [vmem:[%s1994_s29 + $0x28] sm:$0xff] %v1124_v41  ;;  %v1375_v49 = vadd.f32 %v1374_v60, %v1373_v18 }
 0x236   : > { %v1376_v51 = vpop.f32.mrf.mxu1 }
 0x237   : > { %v1129_v52 = vadd.f32 %v1375_v49, %v1989_v23 }
 0x238   : > { %v1377_v54 = vpop.f32.mrf.mxu1 }
 0x239   : > { %1173 = vst [vmem:[%s1994_s29 + $0x30] sm:$0xff] %v1129_v52  ;;  %v1378_v24 = vadd.f32 %v1377_v54, %v1376_v51 }
 0x23a   : > { %v1379_v29 = vpop.f32.mrf.mxu1 }
 0x23b   : > { %v1132_v22 = vadd.f32 %v1378_v24, %v1989_v23 }
 0x23c   : > { %v1380_v36 = vpop.f32.mrf.mxu1 }
 0x23d   : > { %1174 = vst [vmem:[%s1994_s29 + $0x38] sm:$0xff] %v1132_v22  ;;  %v1381_v9 = vadd.f32 %v1380_v36, %v1379_v29 }
 0x23e   : > { %v1382_v56 = vpop.f32.mrf.mxu1 }
 0x23f   : > { %v1137_v44 = vadd.f32 %v1381_v9, %v1989_v23 }
 0x240   : > { %v1383_v31 = vpop.f32.mrf.mxu1 }
 0x241   : > { %1175 = vst [vmem:[%s1994_s29 + $0x40] sm:$0xff] %v1137_v44  ;;  %v1384_v55 = vadd.f32 %v1383_v31, %v1382_v56 }
 0x242   : > { %v1385_v26 = vpop.f32.mrf.mxu1 }
 0x243   : > { %v1140_v4 = vadd.f32 %v1384_v55, %v1989_v23 }
 0x244   : > { %v1386_v27 = vpop.f32.mrf.mxu1 }
 0x245   : > { %1176 = vst [vmem:[%s1994_s29 + $0x48] sm:$0xff] %v1140_v4  ;;  %v1387_v59 = vadd.f32 %v1386_v27, %v1385_v26 }
 0x246   : > { %v1388_v34 = vpop.f32.mrf.mxu1 }
 0x247   : > { %v1145_v50 = vadd.f32 %v1387_v59, %v1989_v23 }
 0x248   : > { %v1389_v2 = vpop.f32.mrf.mxu1 }
 0x249   : > { %1177 = vst [vmem:[%s1994_s29 + $0x50] sm:$0xff] %v1145_v50  ;;  %v1390_v40 = vadd.f32 %v1389_v2, %v1388_v34 }
 0x24a   : > { %v1391_v16 = vpop.f32.mrf.mxu1 }
 0x24b   : > { %v1148_v53 = vadd.f32 %v1390_v40, %v1989_v23 }
 0x24c   : > { %v1392_v61 = vpop.f32.mrf.mxu1 }
 0x24d   : > { %1178 = vst [vmem:[%s1994_s29 + $0x58] sm:$0xff] %v1148_v53  ;;  %v1393_v3 = vadd.f32 %v1392_v61, %v1391_v16 }
 0x24e   : > { %v1394_v12 = vpop.f32.mrf.mxu1 }
 0x24f   : > { %v1153_v17 = vadd.f32 %v1393_v3, %v1989_v23 }
 0x250   : > { %v1395_v63 = vpop.f32.mrf.mxu1 }
 0x251   : > { %1179 = vst [vmem:[%s1994_s29 + $0x60] sm:$0xff] %v1153_v17  ;;  %v1396_v46 = vadd.f32 %v1395_v63, %v1394_v12 }
 0x252   : > { %v1397_v47 = vpop.f32.mrf.mxu1 }
 0x253   : > { %v1156_v8 = vadd.f32 %v1396_v46, %v1989_v23 }
 0x254   : > { %v1398_v5 = vpop.f32.mrf.mxu1 }
 0x255   : > { %1180 = vst [vmem:[%s1994_s29 + $0x68] sm:$0xff] %v1156_v8  ;;  %v1399_v0 = vadd.f32 %v1398_v5, %v1397_v47 }
 0x256   : > { %v1400_v58 = vpop.f32.mrf.mxu1 }
 0x257   : > { %v1161_v48 = vadd.f32 %v1399_v0, %v1989_v23 }
 0x258   : > { %v1401_v39 = vpop.f32.mrf.mxu1 }
 0x259   : > { %1181 = vst [vmem:[%s1994_s29 + $0x70] sm:$0xff] %v1161_v48  ;;  %v1402_v30 = vadd.f32 %v1401_v39, %v1400_v58 }
 0x25b   : > { %v1164_v45 = vadd.f32 %v1402_v30, %v1989_v23 }
 0x25d   : > { %1182 = vst [vmem:[%s1994_s29 + $0x78] sm:$0xff] %v1164_v45 }
 0x25e PF: > { %s15_s18 = sadd.s32 1, %s1535_s18  }
 0x25f   : > { %p12_p4 = scmp.ge.s32.totalorder %s15_s18, 5  }
 0x261   :  { %14 = sbr.rel (!%p12_p4) target bundleno = 1 (0x1), region = 70 }

</bundles_post_ra>
